<compile_context>
chip_gen: v5e
topology: v5e:2x2
jax: 0.10.0
libtpu: 0.0.40
codegen_flags: <defaults>
</compile_context>

<pallas_src>
import functools
import math

import jax
import jax.numpy as jnp
from jax.experimental import pallas as pl
from jax.experimental.pallas import tpu as pltpu

_LANE = 128      # lane width: last dims padded to multiples of this
_SUBLANE = 8     # sublane width: row counts padded to multiples of this


def _round_up(n, m):
    return ((n + m - 1) // m) * m


def _pad2d(a, rows, cols):
    r, c = a.shape
    return jnp.pad(a, ((0, rows - r), (0, cols - c)))


def _pack_classifier_params(params):
    """Pad every (w1, b1, w2, b2) to (8,128)-aligned tiles ONCE, group arrays
    by padded lane width, and concatenate each group's rows into one packed
    buffer.

    Returns (buffers, layer_meta):
      buffers    : list of packed 2-D f32 arrays (one per distinct lane width)
      layer_meta : per layer, a 4-tuple of (buffer_idx, row_start, n_rows) for
                   w1, b1, w2, b2 -- static slice descriptors for the kernel.
    Zero padding keeps the math exact (GELU(0)=0, zero rows/cols propagate
    zeros through every layer).
    """
    entries = []
    for (w1, b1, w2, b2) in params:
        idim, hdim = w1.shape
        odim = w2.shape[1]
        idim_p = _round_up(idim, _LANE)
        hdim_p = _round_up(hdim, _LANE)
        odim_p = _round_up(odim, _LANE)
        entries.append([
            (_pad2d(w1, idim_p, hdim_p), hdim_p),
            (_pad2d(b1, 1, hdim_p), hdim_p),
            (_pad2d(w2, hdim_p, odim_p), odim_p),
            (_pad2d(b2, 1, odim_p), odim_p),
        ])

    widths = sorted({w for layer in entries for (_, w) in layer})
    width_to_buf = {w: i for i, w in enumerate(widths)}
    pieces = [[] for _ in widths]
    rows_used = [0] * len(widths)
    layer_meta = []
    for layer in entries:
        lm = []
        for (arr, w) in layer:
            bi = width_to_buf[w]
            r0 = rows_used[bi]
            nrows = arr.shape[0]
            nrows_pad = _round_up(nrows, _SUBLANE)   # keep slices tile-aligned
            if nrows_pad != nrows:
                arr = jnp.pad(arr, ((0, nrows_pad - nrows), (0, 0)))
            pieces[bi].append(arr)
            rows_used[bi] += nrows_pad
            lm.append((bi, r0, nrows))
        layer_meta.append(tuple(lm))

    buffers = [jnp.concatenate(p, axis=0) for p in pieces]
    return buffers, tuple(layer_meta)


def _fused_classifier_kernel(layer_meta, *refs):
    """One fused kernel for the whole block stack.

    refs layout: x_ref, packed_buf_refs..., o_ref.  The Python layer loop is
    unrolled at trace time (shapes differ per layer); intermediates stay in
    VMEM/vregs and never touch HBM.  Parameters are recovered from the packed
    buffers via static, 8-row-aligned slices (zero-cost views).
    """
    x_ref = refs[0]
    o_ref = refs[-1]
    buf_refs = refs[1:-1]

    def load(meta):
        bi, r0, nr = meta
        return buf_refs[bi][r0:r0 + nr, :]

    h = x_ref[...]
    inv_sqrt2 = 1.0 / math.sqrt(2.0)
    for (w1m, b1m, w2m, b2m) in layer_meta:
        # fc1 (MXU, f32 acc) + bias
        z = jnp.dot(h, load(w1m), preferred_element_type=jnp.float32) + load(b1m)
        # Exact erf GELU (torch.nn.GELU default).
        z = 0.5 * z * (1.0 + jax.lax.erf(z * inv_sqrt2))
        # fc2 (MXU, f32 acc) + bias
        h = jnp.dot(z, load(w2m), preferred_element_type=jnp.float32) + load(b2m)
    o_ref[...] = h.astype(o_ref.dtype)


def make_classifier_forward(params):
    """Build a jitted forward for `Classifier` with params pre-padded/packed
    once (not per call)."""
    buffers, layer_meta = _pack_classifier_params(params)

    in_dim = params[0][0].shape[0]
    num_cls = params[-1][2].shape[1]
    in_dim_p = _round_up(in_dim, _LANE)
    out_p = _round_up(num_cls, _LANE)

    padded_dims = []
    for (w1, _, w2, _) in params:
        padded_dims.append((_round_up(w1.shape[0], _LANE),
                            _round_up(w1.shape[1], _LANE),
                            _round_up(w2.shape[1], _LANE)))

    param_bytes = sum(int(b.size) * 4 for b in buffers)
    max_width = max(b.shape[1] for b in buffers)
    kernel = functools.partial(_fused_classifier_kernel, layer_meta)

    @jax.jit
    def forward(x, *bufs):
        batch = x.shape[0]
        # Batch tile: 256 rows once non-toy (fills MXU rows, shards across
        # v7x's 2 TCs via the parallel grid axis); otherwise one 8-aligned
        # block.
        tb = 256 if batch >= 256 else _round_up(batch, _SUBLANE)
        batch_p = _round_up(batch, tb)
        grid = (batch_p // tb,)

        xp = _pad2d(x.astype(jnp.float32), batch_p, in_dim_p)

        # Advisory cost estimate.
        flops = 0
        transcendentals = 0
        for (idim_p, hdim_p, odim_p) in padded_dims:
            flops += 2 * batch_p * (idim_p * hdim_p + hdim_p * odim_p)
            transcendentals += batch_p * hdim_p
        io_hbm_bytes = (batch_p * in_dim_p + batch_p * out_p) * 4
        bytes_accessed = io_hbm_bytes + param_bytes

        # VMEM sized to actual footprint (double-buffered blocks + packed
        # params + activation headroom), not a blanket 32 MiB.
        io_vmem = 2 * (tb * in_dim_p + tb * out_p) * 4
        act_vmem = 4 * tb * max_width * 4
        vmem_limit = int(2 * param_bytes + io_vmem + act_vmem + (4 << 20))

        in_specs = [pl.BlockSpec((tb, in_dim_p), lambda i: (i, 0))]
        # Packed parameter buffers: whole-array blocks, constant index map so
        # they are fetched once and stay VMEM-resident across batch tiles.
        in_specs += [pl.BlockSpec(b.shape, lambda i: (0, 0)) for b in bufs]
        out_specs = pl.BlockSpec((tb, out_p), lambda i: (i, 0))

        out_padded = pl.pallas_call(
            kernel,
            out_shape=jax.ShapeDtypeStruct((batch_p, out_p), jnp.float32),
            grid=grid,
            in_specs=in_specs,
            out_specs=out_specs,
            compiler_params=pltpu.CompilerParams(
                dimension_semantics=("parallel",),
                vmem_limit_bytes=vmem_limit),
            cost_estimate=pl.CostEstimate(
                flops=flops,
                transcendentals=transcendentals,
                bytes_accessed=bytes_accessed),
        )(xp, *bufs)

        return out_padded[:batch, :num_cls]

    return lambda x: forward(x, *buffers)


def init_classifier_params(key, dim, num_cls, n_layer):
    """Deterministic PyTorch-Linear-style init (uniform +-1/sqrt(fan_in)).

    Weights are stored as [in_features, out_features] (transposed vs torch)
    so the kernel computes x @ W + b.
    """
    dims = [(dim // 2 ** i, dim // 2 ** (i + 1)) for i in range(n_layer - 1)]
    dims.append((dim // 2 ** (n_layer - 1), num_cls))

    params = []
    for (idim, odim) in dims:
        hdim = 4 * idim
        key, k1, k2, k3, k4 = jax.random.split(key, 5)
        bound1 = 1.0 / math.sqrt(idim)
        bound2 = 1.0 / math.sqrt(hdim)
        w1 = jax.random.uniform(k1, (idim, hdim), jnp.float32, -bound1, bound1)
        b1 = jax.random.uniform(k2, (1, hdim), jnp.float32, -bound1, bound1)
        w2 = jax.random.uniform(k3, (hdim, odim), jnp.float32, -bound2, bound2)
        b2 = jax.random.uniform(k4, (1, odim), jnp.float32, -bound2, bound2)
        params.append((w1, b1, w2, b2))
    return params


def _reference_forward(x, params):
    """Pure-JAX reference for correctness checking (exact erf GELU)."""
    for (w1, b1, w2, b2) in params:
        h = x @ w1 + b1
        h = 0.5 * h * (1.0 + jax.lax.erf(h / math.sqrt(2.0)))
        x = h @ w2 + b2
    return x


if __name__ == "__main__":
    # Small shapes consistent with the module: dim divisible by 2**(n_layer-1).
    batch, dim, num_cls, n_layer = 8, 64, 8, 4

    key = jax.random.PRNGKey(0)
    key, xkey = jax.random.split(key)
    x = jax.random.normal(xkey, (batch, dim), dtype=jnp.float32)

    params = init_classifier_params(key, dim, num_cls, n_layer)
    classifier_forward = make_classifier_forward(params)

    out = jax.block_until_ready(classifier_forward(x))

    ref = _reference_forward(x, params)
    assert out.shape == (batch, num_cls), out.shape
    assert jnp.allclose(out, ref, atol=1e-4, rtol=1e-4), "mismatch vs reference"

    print("KERNEL_OK")
</pallas_src>

<mosaic_0001>
module attributes {stable_mosaic.version = 11 : i64} {
  func.func @_fused_classifier_kernel(%arg0: i32, %arg1: memref<8x128xf32, #tpu.memory_space<vmem>>, %arg2: memref<1080x128xf32, #tpu.memory_space<vmem>>, %arg3: memref<136x256xf32, #tpu.memory_space<vmem>>, %arg4: memref<8x128xf32, #tpu.memory_space<vmem>>) attributes {dimension_semantics = [#tpu.dimension_semantics<parallel>], iteration_bounds = array<i64: 1>, scalar_prefetch = 0 : i64, scratch_operands = 0 : i64, tpu.core_type = #tpu.core_type<tc>, window_params = [{transform_indices = @transform_0, window_bounds = array<i64: 8, 128>}, {pipeline_mode = #tpu.pipeline_mode<synchronous>, transform_indices = @transform_1, window_bounds = array<i64: 1080, 128>}, {pipeline_mode = #tpu.pipeline_mode<synchronous>, transform_indices = @transform_2, window_bounds = array<i64: 136, 256>}, {transform_indices = @transform_3, window_bounds = array<i64: 8, 128>}]} {
    %c0 = arith.constant 0 : index
    %c0_0 = arith.constant 0 : index
    %0 = vector.load %arg1[%c0, %c0_0] : memref<8x128xf32, #tpu.memory_space<vmem>>, vector<8x128xf32>
    %c0_1 = arith.constant 0 : index
    %c0_2 = arith.constant 0 : index
    %1 = vector.load %arg3[%c0_1, %c0_2] : memref<136x256xf32, #tpu.memory_space<vmem>>, vector<128x256xf32>
    %cst = arith.constant dense<0.000000e+00> : vector<8x256xf32>
    %2 = tpu.matmul %0, %1, %cst {dimension_numbers = #tpu.dot_dimension_numbers<[1], [0], [0], [1], [0, 0, 1, 1], [], []>} : vector<8x128xf32>, vector<128x256xf32>, vector<8x256xf32> -> vector<8x256xf32>
    %c128 = arith.constant 128 : index
    %c0_3 = arith.constant 0 : index
    %3 = vector.load %arg3[%c128, %c0_3] : memref<136x256xf32, #tpu.memory_space<vmem>>, vector<1x256xf32>
    %4 = vector.broadcast %3 : vector<1x256xf32> to vector<8x256xf32>
    %5 = arith.addf %2, %4 : vector<8x256xf32>
    %cst_4 = arith.constant 5.000000e-01 : f32
    %6 = vector.broadcast %cst_4 : f32 to vector<8x256xf32>
    %7 = arith.mulf %6, %5 : vector<8x256xf32>
    %cst_5 = arith.constant 0.707106769 : f32
    %8 = vector.broadcast %cst_5 : f32 to vector<8x256xf32>
    %9 = arith.mulf %5, %8 : vector<8x256xf32>
    %10 = math.erf %9 : vector<8x256xf32>
    %cst_6 = arith.constant 1.000000e+00 : f32
    %11 = vector.broadcast %cst_6 : f32 to vector<8x256xf32>
    %12 = arith.addf %11, %10 : vector<8x256xf32>
    %13 = arith.mulf %7, %12 : vector<8x256xf32>
    %c0_7 = arith.constant 0 : index
    %c0_8 = arith.constant 0 : index
    %14 = vector.load %arg2[%c0_7, %c0_8] : memref<1080x128xf32, #tpu.memory_space<vmem>>, vector<256x128xf32>
    %cst_9 = arith.constant dense<0.000000e+00> : vector<8x128xf32>
    %15 = tpu.matmul %13, %14, %cst_9 {dimension_numbers = #tpu.dot_dimension_numbers<[1], [0], [0], [1], [0, 0, 1, 1], [], []>} : vector<8x256xf32>, vector<256x128xf32>, vector<8x128xf32> -> vector<8x128xf32>
    %c256 = arith.constant 256 : index
    %c0_10 = arith.constant 0 : index
    %16 = vector.load %arg2[%c256, %c0_10] : memref<1080x128xf32, #tpu.memory_space<vmem>>, vector<1x128xf32>
    %17 = vector.broadcast %16 : vector<1x128xf32> to vector<8x128xf32>
    %18 = arith.addf %15, %17 : vector<8x128xf32>
    %c264 = arith.constant 264 : index
    %c0_11 = arith.constant 0 : index
    %19 = vector.load %arg2[%c264, %c0_11] : memref<1080x128xf32, #tpu.memory_space<vmem>>, vector<128x128xf32>
    %cst_12 = arith.constant dense<0.000000e+00> : vector<8x128xf32>
    %20 = tpu.matmul %18, %19, %cst_12 {dimension_numbers = #tpu.dot_dimension_numbers<[1], [0], [0], [1], [0, 0, 1, 1], [], []>} : vector<8x128xf32>, vector<128x128xf32>, vector<8x128xf32> -> vector<8x128xf32>
    %c392 = arith.constant 392 : index
    %c0_13 = arith.constant 0 : index
    %21 = vector.load %arg2[%c392, %c0_13] : memref<1080x128xf32, #tpu.memory_space<vmem>>, vector<1x128xf32>
    %22 = vector.broadcast %21 : vector<1x128xf32> to vector<8x128xf32>
    %23 = arith.addf %20, %22 : vector<8x128xf32>
    %cst_14 = arith.constant 5.000000e-01 : f32
    %24 = vector.broadcast %cst_14 : f32 to vector<8x128xf32>
    %25 = arith.mulf %24, %23 : vector<8x128xf32>
    %cst_15 = arith.constant 0.707106769 : f32
    %26 = vector.broadcast %cst_15 : f32 to vector<8x128xf32>
    %27 = arith.mulf %23, %26 : vector<8x128xf32>
    %28 = math.erf %27 : vector<8x128xf32>
    %cst_16 = arith.constant 1.000000e+00 : f32
    %29 = vector.broadcast %cst_16 : f32 to vector<8x128xf32>
    %30 = arith.addf %29, %28 : vector<8x128xf32>
    %31 = arith.mulf %25, %30 : vector<8x128xf32>
    %c400 = arith.constant 400 : index
    %c0_17 = arith.constant 0 : index
    %32 = vector.load %arg2[%c400, %c0_17] : memref<1080x128xf32, #tpu.memory_space<vmem>>, vector<128x128xf32>
    %cst_18 = arith.constant dense<0.000000e+00> : vector<8x128xf32>
    %33 = tpu.matmul %31, %32, %cst_18 {dimension_numbers = #tpu.dot_dimension_numbers<[1], [0], [0], [1], [0, 0, 1, 1], [], []>} : vector<8x128xf32>, vector<128x128xf32>, vector<8x128xf32> -> vector<8x128xf32>
    %c528 = arith.constant 528 : index
    %c0_19 = arith.constant 0 : index
    %34 = vector.load %arg2[%c528, %c0_19] : memref<1080x128xf32, #tpu.memory_space<vmem>>, vector<1x128xf32>
    %35 = vector.broadcast %34 : vector<1x128xf32> to vector<8x128xf32>
    %36 = arith.addf %33, %35 : vector<8x128xf32>
    %c536 = arith.constant 536 : index
    %c0_20 = arith.constant 0 : index
    %37 = vector.load %arg2[%c536, %c0_20] : memref<1080x128xf32, #tpu.memory_space<vmem>>, vector<128x128xf32>
    %cst_21 = arith.constant dense<0.000000e+00> : vector<8x128xf32>
    %38 = tpu.matmul %36, %37, %cst_21 {dimension_numbers = #tpu.dot_dimension_numbers<[1], [0], [0], [1], [0, 0, 1, 1], [], []>} : vector<8x128xf32>, vector<128x128xf32>, vector<8x128xf32> -> vector<8x128xf32>
    %c664 = arith.constant 664 : index
    %c0_22 = arith.constant 0 : index
    %39 = vector.load %arg2[%c664, %c0_22] : memref<1080x128xf32, #tpu.memory_space<vmem>>, vector<1x128xf32>
    %40 = vector.broadcast %39 : vector<1x128xf32> to vector<8x128xf32>
    %41 = arith.addf %38, %40 : vector<8x128xf32>
    %cst_23 = arith.constant 5.000000e-01 : f32
    %42 = vector.broadcast %cst_23 : f32 to vector<8x128xf32>
    %43 = arith.mulf %42, %41 : vector<8x128xf32>
    %cst_24 = arith.constant 0.707106769 : f32
    %44 = vector.broadcast %cst_24 : f32 to vector<8x128xf32>
    %45 = arith.mulf %41, %44 : vector<8x128xf32>
    %46 = math.erf %45 : vector<8x128xf32>
    %cst_25 = arith.constant 1.000000e+00 : f32
    %47 = vector.broadcast %cst_25 : f32 to vector<8x128xf32>
    %48 = arith.addf %47, %46 : vector<8x128xf32>
    %49 = arith.mulf %43, %48 : vector<8x128xf32>
    %c672 = arith.constant 672 : index
    %c0_26 = arith.constant 0 : index
    %50 = vector.load %arg2[%c672, %c0_26] : memref<1080x128xf32, #tpu.memory_space<vmem>>, vector<128x128xf32>
    %cst_27 = arith.constant dense<0.000000e+00> : vector<8x128xf32>
    %51 = tpu.matmul %49, %50, %cst_27 {dimension_numbers = #tpu.dot_dimension_numbers<[1], [0], [0], [1], [0, 0, 1, 1], [], []>} : vector<8x128xf32>, vector<128x128xf32>, vector<8x128xf32> -> vector<8x128xf32>
    %c800 = arith.constant 800 : index
    %c0_28 = arith.constant 0 : index
    %52 = vector.load %arg2[%c800, %c0_28] : memref<1080x128xf32, #tpu.memory_space<vmem>>, vector<1x128xf32>
    %53 = vector.broadcast %52 : vector<1x128xf32> to vector<8x128xf32>
    %54 = arith.addf %51, %53 : vector<8x128xf32>
    %c808 = arith.constant 808 : index
    %c0_29 = arith.constant 0 : index
    %55 = vector.load %arg2[%c808, %c0_29] : memref<1080x128xf32, #tpu.memory_space<vmem>>, vector<128x128xf32>
    %cst_30 = arith.constant dense<0.000000e+00> : vector<8x128xf32>
    %56 = tpu.matmul %54, %55, %cst_30 {dimension_numbers = #tpu.dot_dimension_numbers<[1], [0], [0], [1], [0, 0, 1, 1], [], []>} : vector<8x128xf32>, vector<128x128xf32>, vector<8x128xf32> -> vector<8x128xf32>
    %c936 = arith.constant 936 : index
    %c0_31 = arith.constant 0 : index
    %57 = vector.load %arg2[%c936, %c0_31] : memref<1080x128xf32, #tpu.memory_space<vmem>>, vector<1x128xf32>
    %58 = vector.broadcast %57 : vector<1x128xf32> to vector<8x128xf32>
    %59 = arith.addf %56, %58 : vector<8x128xf32>
    %cst_32 = arith.constant 5.000000e-01 : f32
    %60 = vector.broadcast %cst_32 : f32 to vector<8x128xf32>
    %61 = arith.mulf %60, %59 : vector<8x128xf32>
    %cst_33 = arith.constant 0.707106769 : f32
    %62 = vector.broadcast %cst_33 : f32 to vector<8x128xf32>
    %63 = arith.mulf %59, %62 : vector<8x128xf32>
    %64 = math.erf %63 : vector<8x128xf32>
    %cst_34 = arith.constant 1.000000e+00 : f32
    %65 = vector.broadcast %cst_34 : f32 to vector<8x128xf32>
    %66 = arith.addf %65, %64 : vector<8x128xf32>
    %67 = arith.mulf %61, %66 : vector<8x128xf32>
    %c944 = arith.constant 944 : index
    %c0_35 = arith.constant 0 : index
    %68 = vector.load %arg2[%c944, %c0_35] : memref<1080x128xf32, #tpu.memory_space<vmem>>, vector<128x128xf32>
    %cst_36 = arith.constant dense<0.000000e+00> : vector<8x128xf32>
    %69 = tpu.matmul %67, %68, %cst_36 {dimension_numbers = #tpu.dot_dimension_numbers<[1], [0], [0], [1], [0, 0, 1, 1], [], []>} : vector<8x128xf32>, vector<128x128xf32>, vector<8x128xf32> -> vector<8x128xf32>
    %c1072 = arith.constant 1072 : index
    %c0_37 = arith.constant 0 : index
    %70 = vector.load %arg2[%c1072, %c0_37] : memref<1080x128xf32, #tpu.memory_space<vmem>>, vector<1x128xf32>
    %71 = vector.broadcast %70 : vector<1x128xf32> to vector<8x128xf32>
    %72 = arith.addf %69, %71 : vector<8x128xf32>
    %c0_38 = arith.constant 0 : index
    %c0_39 = arith.constant 0 : index
    %73 = vector.load %arg4[%c0_38, %c0_39] : memref<8x128xf32, #tpu.memory_space<vmem>>, vector<8x128xf32>
    tpu.vector_store %arg4[%c0_38, %c0_39], %72 {strides = array<i32>} : memref<8x128xf32, #tpu.memory_space<vmem>>, vector<8x128xf32>,
    return
  }
  func.func @transform_0(%arg0: i32) -> (i32, i32) {
    %c0_i32 = arith.constant 0 : i32
    %c0_i32_0 = arith.constant 0 : i32
    return %arg0, %c0_i32 : i32, i32
  }
  func.func @transform_1(%arg0: i32) -> (i32, i32) {
    %c0_i32 = arith.constant 0 : i32
    %c0_i32_0 = arith.constant 0 : i32
    %c0_i32_1 = arith.constant 0 : i32
    return %c0_i32, %c0_i32_0 : i32, i32
  }
  func.func @transform_2(%arg0: i32) -> (i32, i32) {
    %c0_i32 = arith.constant 0 : i32
    %c0_i32_0 = arith.constant 0 : i32
    %c0_i32_1 = arith.constant 0 : i32
    return %c0_i32, %c0_i32_0 : i32, i32
  }
  func.func @transform_3(%arg0: i32) -> (i32, i32) {
    %c0_i32 = arith.constant 0 : i32
    %c0_i32_0 = arith.constant 0 : i32
    return %arg0, %c0_i32 : i32, i32
  }
}

</mosaic_0001>

<bundles_post_ra>
// kernel: forward.1
= control target key start
LH: loop header
LB: loop body
LE: loop exit
PB: predicated region body
PF: predicated region fallthrough
CT: control target
= control target key end

     0   :  { %8 = vsyncpa [#allocation3], 0  ;;  %s878_s0 = inlined_call_operand.vmem [shape: f32[8,128], index: 0, kind: input, shape index: {}]   ;;  %s879_s1 = inlined_call_operand.hbm [shape: f32[1080,128], index: 1, kind: input, shape index: {}]   ;;  %s880_s2 = inlined_call_operand.hbm [shape: f32[136,256], index: 2, kind: input, shape index: {}]   ;;  %s881_s3 = inlined_call_operand.hbm [shape: f32[8,128], index: 3, kind: output, shape index: {}]  }
   0x1   :  { %9 = vsyncpa [#allocation6], 0 }
   0x2   :  { %10 = vsyncpa [#allocation4], 0  ;;  %s17_s14 = sshll.u32 %s879_s1, 4  ;;  %s775_s15 = smov [#allocation2]   ;;  %s18_s14 = int_to_ptr.hbm [resolvable:$true] %s17_s14 }
   0x3   :  { %s19_s16 = sshll.u32 %s775_s15, 4  ;;  %s30_s19 = sshll.u32 %s880_s2, 4  ;;  %s20_s16 = int_to_ptr.vmem [resolvable:$true] %s19_s16  ;;  %s31_s19 = int_to_ptr.hbm [resolvable:$true] %s30_s19 }
   0x4   :  { %s776_s20 = smov 128   ;;  %s777_s21 = smov 8  }
   0x5   :  { %25 = dma.hbm_to_vmem [thread:$0]  %s18_s14, 17280, %s20_s16, [#allocation3], %s776_s20, %s776_s20, %s777_s21  }
   0x6   :  { %s778_s22 = smov [#allocation5]   ;;  %s779_s24 = smov 256  }
   0x7   :  { %s32_s23 = sshll.u32 %s778_s22, 4  ;;  %s780_s25 = smov 16   ;;  %s33_s23 = int_to_ptr.vmem [resolvable:$true] %s32_s23 }
   0x8   :  { %38 = dma.hbm_to_vmem [thread:$0]  %s31_s19, 4352, %s33_s23, [#allocation6], %s779_s24, %s779_s24, %s780_s25  }
   0x9   :  { %769 = dma.done.wait [#allocation3], 17280  }
   0xa   :  { %770 = vsyncadd [#allocation3], 4294950016 }
   0xb   :  { %771 = dma.done.wait [#allocation6], 4352  }
   0xc   :  { %772 = vsyncadd [#allocation6], 4294962944  ;;  %v78_v0 = vld [vmem:[#allocation5 + $0xf0] sm:$0xff]  ;;  %v79_v1 = vld [vmem:[#allocation5 + $0xf8] sm:$0xff]  ;;  %s657_s29 = sshll.u32 %s881_s3, 4  ;;  %s658_s29 = int_to_ptr.hbm [resolvable:$true] %s657_s29 }
   0xd   :  { %v76_v2 = vld [vmem:[#allocation5 + $0xe0] sm:$0xff]  ;;  %87 = vmatpush.msra.mxu0 %v78_v0  ;;  %107 = vmatpush.msra.mxu1 %v79_v1  ;;  %v77_v3 = vld [vmem:[#allocation5 + $0xe8] sm:$0xff]  ;;  %v74_v4 = vld [vmem:[#allocation5 + $0xd0] sm:$0xff] }
   0xe   :  { %v75_v5 = vld [vmem:[#allocation5 + $0xd8] sm:$0xff]  ;;  %v72_v6 = vld [vmem:[#allocation5 + $0xc0] sm:$0xff]  ;;  %v73_v7 = vld [vmem:[#allocation5 + $0xc8] sm:$0xff] }
   0xf   :  { %88 = vmatpush.msra.mxu0 %v76_v2  ;;  %108 = vmatpush.msra.mxu1 %v77_v3  ;;  %v70_v8 = vld [vmem:[#allocation5 + $0xb0] sm:$0xff]  ;;  %v71_v9 = vld [vmem:[#allocation5 + $0xb8] sm:$0xff]  ;;  %v68_v10 = vld [vmem:[#allocation5 + $0xa0] sm:$0xff] }
  0x10   :  { %v69_v11 = vld [vmem:[#allocation5 + $0xa8] sm:$0xff]  ;;  %v66_v12 = vld [vmem:[#allocation5 + $0x90] sm:$0xff]  ;;  %v67_v13 = vld [vmem:[#allocation5 + $0x98] sm:$0xff] }
  0x11   :  { %89 = vmatpush.msra.mxu0 %v74_v4  ;;  %109 = vmatpush.msra.mxu1 %v75_v5  ;;  %v64_v14 = vld [vmem:[#allocation5 + $0x80] sm:$0xff]  ;;  %v65_v15 = vld [vmem:[#allocation5 + $0x88] sm:$0xff]  ;;  %v62_v16 = vld [vmem:[#allocation5 + $0x70] sm:$0xff] }
  0x12   :  { %v63_v17 = vld [vmem:[#allocation5 + $0x78] sm:$0xff]  ;;  %v60_v18 = vld [vmem:[#allocation5 + $0x60] sm:$0xff]  ;;  %v61_v19 = vld [vmem:[#allocation5 + $0x68] sm:$0xff] }
  0x13   :  { %90 = vmatpush.msra.mxu0 %v72_v6  ;;  %110 = vmatpush.msra.mxu1 %v73_v7  ;;  %v58_v20 = vld [vmem:[#allocation5 + $0x50] sm:$0xff]  ;;  %v59_v21 = vld [vmem:[#allocation5 + $0x58] sm:$0xff]  ;;  %v56_v22 = vld [vmem:[#allocation5 + $0x40] sm:$0xff] }
  0x14   :  { %v57_v23 = vld [vmem:[#allocation5 + $0x48] sm:$0xff]  ;;  %v54_v24 = vld [vmem:[#allocation5 + $0x30] sm:$0xff]  ;;  %v55_v25 = vld [vmem:[#allocation5 + $0x38] sm:$0xff] }
  0x15   :  { %91 = vmatpush.msra.mxu0 %v70_v8  ;;  %111 = vmatpush.msra.mxu1 %v71_v9  ;;  %v52_v26 = vld [vmem:[#allocation5 + $0x20] sm:$0xff]  ;;  %v53_v27 = vld [vmem:[#allocation5 + $0x28] sm:$0xff]  ;;  %v50_v28 = vld [vmem:[#allocation5 + $0x10] sm:$0xff] }
  0x16   :  { %v51_v29 = vld [vmem:[#allocation5 + $0x18] sm:$0xff]  ;;  %v48_v30 = vld [vmem:[#allocation5] sm:$0xff]  ;;  %v49_v31 = vld [vmem:[#allocation5 + $0x8] sm:$0xff] }
  0x17   :  { %92 = vmatpush.msra.mxu0 %v68_v10  ;;  %112 = vmatpush.msra.mxu1 %v69_v11  ;;  %v47_v32 = vld [vmem:[%s878_s0] sm:$0xff]  ;;  %v230_v33 = vld [vmem:[#allocation2 + $0x78] sm:$0xff]  ;;  %v229_v35 = vld [vmem:[#allocation2 + $0x70] sm:$0xff]  ;;  %s781_s0 = smov [#allocation7]  }
  0x18   :  { %v246_v34 = vld [vmem:[#allocation2 + $0xf8] sm:$0xff]  ;;  %249 = vmatpush.msra.mxu2 %v230_v33  ;;  %v245_v36 = vld [vmem:[#allocation2 + $0xf0] sm:$0xff]  ;;  %v228_v38 = vld [vmem:[#allocation2 + $0x68] sm:$0xff]  ;;  %s655_s26 = sshll.u32 %s781_s0, 4  ;;  %s656_s26 = int_to_ptr.vmem [resolvable:$true] %s655_s26 }
  0x19   :  { %93 = vmatpush.msra.mxu0 %v66_v12  ;;  %113 = vmatpush.msra.mxu1 %v67_v13  ;;  %v81_v37 = vld [vmem:[#allocation5 + $0x100] ss:$8 sm:$0x3]  ;;  %v244_v39 = vld [vmem:[#allocation2 + $0xe8] sm:$0xff]  ;;  %v225_v46 = vld [vmem:[#allocation2 + $0x50] sm:$0xff] }
  0x1a   :  { %269 = vmatpush.msra.mxu3 %v246_v34  ;;  %250 = vmatpush.msra.mxu2 %v229_v35  ;;  %v227_v40 = vld [vmem:[#allocation2 + $0x60] sm:$0xff]  ;;  %v83_v42 = vperm.slane %v81_v37, 0  ;;  %v84_v43 = vperm.slane %v81_v37, 1  ;;  %v226_v44 = vld [vmem:[#allocation2 + $0x58] sm:$0xff]  ;;  %v241_v47 = vld [vmem:[#allocation2 + $0xd0] sm:$0xff] }
  0x1b   :  { %94 = vmatpush.msra.mxu0 %v64_v14  ;;  %114 = vmatpush.msra.mxu1 %v65_v15  ;;  %v243_v41 = vld [vmem:[#allocation2 + $0xe0] sm:$0xff]  ;;  %v242_v45 = vld [vmem:[#allocation2 + $0xd8] sm:$0xff]  ;;  %v224_v50 = vld [vmem:[#allocation2 + $0x48] sm:$0xff] }
  0x1c   :  { %270 = vmatpush.msra.mxu3 %v245_v36  ;;  %251 = vmatpush.msra.mxu2 %v228_v38  ;;  %v240_v51 = vld [vmem:[#allocation2 + $0xc8] sm:$0xff]  ;;  %v223_v54 = vld [vmem:[#allocation2 + $0x40] sm:$0xff]  ;;  %v222_v58 = vld [vmem:[#allocation2 + $0x38] sm:$0xff] }
  0x1d   :  { %95 = vmatpush.msra.mxu0 %v62_v16  ;;  %115 = vmatpush.msra.mxu1 %v63_v17  ;;  %v239_v55 = vld [vmem:[#allocation2 + $0xc0] sm:$0xff]  ;;  %v238_v59 = vld [vmem:[#allocation2 + $0xb8] sm:$0xff]  ;;  %v221_v62 = vld [vmem:[#allocation2 + $0x30] sm:$0xff] }
  0x1e   :  { %271 = vmatpush.msra.mxu3 %v244_v39  ;;  %252 = vmatpush.msra.mxu2 %v227_v40  ;;  %v237_v63 = vld [vmem:[#allocation2 + $0xb0] sm:$0xff]  ;;  %v220_v2 = vld [vmem:[#allocation2 + $0x28] sm:$0xff]  ;;  %v219_v7 = vld [vmem:[#allocation2 + $0x20] sm:$0xff] }
  0x1f   :  { %96 = vmatpush.msra.mxu0 %v60_v18  ;;  %116 = vmatpush.msra.mxu1 %v61_v19  ;;  %v236_v3 = vld [vmem:[#allocation2 + $0xa8] sm:$0xff]  ;;  %v235_v8 = vld [vmem:[#allocation2 + $0xa0] sm:$0xff]  ;;  %v218_v13 = vld [vmem:[#allocation2 + $0x18] sm:$0xff] }
  0x20   :  { %272 = vmatpush.msra.mxu3 %v243_v41  ;;  %253 = vmatpush.msra.mxu2 %v226_v44  ;;  %v234_v14 = vld [vmem:[#allocation2 + $0x98] sm:$0xff]  ;;  %v217_v19 = vld [vmem:[#allocation2 + $0x10] sm:$0xff]  ;;  %v304_v41 = vld [vmem:[#allocation2 + $0x180] sm:$0xff] }
  0x21   :  { %97 = vmatpush.msra.mxu0 %v58_v20  ;;  %117 = vmatpush.msra.mxu1 %v59_v21  ;;  %v233_v20 = vld [vmem:[#allocation2 + $0x90] sm:$0xff] }
  0x22   :  { %273 = vmatpush.msra.mxu3 %v242_v45  ;;  %254 = vmatpush.msra.mxu2 %v225_v46  ;;  %v302_v46 = vld [vmem:[#allocation2 + $0x170] sm:$0xff] }
  0x23   :  { %98 = vmatpush.msra.mxu0 %v56_v22  ;;  %118 = vmatpush.msra.mxu1 %v57_v23 }
  0x24   :  { %274 = vmatpush.msra.mxu3 %v241_v47  ;;  %255 = vmatpush.msra.mxu2 %v224_v50  ;;  %v301_v50 = vld [vmem:[#allocation2 + $0x168] sm:$0xff] }
  0x25   :  { %99 = vmatpush.msra.mxu0 %v54_v24  ;;  %119 = vmatpush.msra.mxu1 %v55_v25  ;;  %v216_v24 = vld [vmem:[#allocation2 + $0x8] sm:$0xff] }
  0x26   :  { %275 = vmatpush.msra.mxu3 %v240_v51  ;;  %256 = vmatpush.msra.mxu2 %v223_v54  ;;  %v232_v25 = vld [vmem:[#allocation2 + $0x88] sm:$0xff]  ;;  %v300_v54 = vld [vmem:[#allocation2 + $0x160] sm:$0xff] }
  0x27   :  { %100 = vmatpush.msra.mxu0 %v52_v26  ;;  %120 = vmatpush.msra.mxu1 %v53_v27 }
  0x28   :  { %276 = vmatpush.msra.mxu3 %v239_v55  ;;  %257 = vmatpush.msra.mxu2 %v222_v58  ;;  %v299_v58 = vld [vmem:[#allocation2 + $0x158] sm:$0xff] }
  0x29   :  { %101 = vmatpush.msra.mxu0 %v50_v28  ;;  %121 = vmatpush.msra.mxu1 %v51_v29  ;;  %v215_v29 = vld [vmem:[#allocation2] sm:$0xff] }
  0x2a   :  { %277 = vmatpush.msra.mxu3 %v238_v59  ;;  %258 = vmatpush.msra.mxu2 %v221_v62 }
  0x2b   :  { %102 = vmatpush.msra.mxu0 %v48_v30  ;;  %122 = vmatpush.msra.mxu1 %v49_v31  ;;  %v231_v30 = vld [vmem:[#allocation2 + $0x80] sm:$0xff] }
  0x2c   :  { %103 = vmatmul.f32.vlgmr.msra.gmra.mxu0 %v47_v32  ;;  %123 = vmatmul.f32.vlgmr.msra.gmra.mxu1 %v47_v32 }
  0x2d   :  { %278 = vmatpush.msra.mxu3 %v237_v63  ;;  %259 = vmatpush.msra.mxu2 %v220_v2 }
  0x2e   :  { %307 = vmatpush.msrb.mxu0 %v304_v41 }
  0x2f   :  { %279 = vmatpush.msra.mxu3 %v236_v3  ;;  %260 = vmatpush.msra.mxu2 %v219_v7  ;;  %v297_v3 = vld [vmem:[#allocation2 + $0x148] sm:$0xff]  ;;  %v296_v7 = vld [vmem:[#allocation2 + $0x140] sm:$0xff] }
  0x31   :  { %280 = vmatpush.msra.mxu3 %v235_v8  ;;  %261 = vmatpush.msra.mxu2 %v218_v13 }
  0x33   :  { %281 = vmatpush.msra.mxu3 %v234_v14  ;;  %262 = vmatpush.msra.mxu2 %v217_v19  ;;  %v295_v14 = vld [vmem:[#allocation2 + $0x138] sm:$0xff] }
  0x35   :  { %282 = vmatpush.msra.mxu3 %v233_v20  ;;  %263 = vmatpush.msra.mxu2 %v216_v24 }
  0x37   :  { %283 = vmatpush.msra.mxu3 %v232_v25  ;;  %264 = vmatpush.msra.mxu2 %v215_v29  ;;  %v292_v29 = vld [vmem:[#allocation2 + $0x120] sm:$0xff] }
  0x39   :  { %284 = vmatpush.msra.mxu3 %v231_v30 }
  0xa9   :  { %v104_v48 = vpop.f32.mrf.mxu0  ;;  %v124_v49 = vpop.f32.mrf.mxu1 }
  0xaa   :  { %v811_v52 = vadd.f32 %v104_v48, %v83_v42  ;;  %v813_v53 = vadd.f32 %v124_v49, %v84_v43  ;;  %v303_v42 = vld [vmem:[#allocation2 + $0x178] sm:$0xff] }
  0xab   :  { %308 = vmatpush.msrb.mxu0 %v303_v42 }
  0xac   :  { %v816_v56 = vmul.f32 0.70710677, %v811_v52  ;;  %v819_v57 = vmul.f32 0.70710677, %v813_v53 }
  0xad   :  { %309 = vmatpush.msrb.mxu0 %v302_v46  ;;  %v681_v46 = vld [vmem:[#allocation2 + $0x188] ss:$0 sm:$0xff] }
  0xae   :  { %v131_v60 = vmul.f32 %v816_v56, %v816_v56  ;;  %v171_v61 = vmul.f32 %v819_v57, %v819_v57 }
  0xaf   :  { %310 = vmatpush.msrb.mxu0 %v301_v50 }
  0xb0   :  { %v825_v0 = vmin.f32 %v131_v60, 16.0  ;;  %v827_v1 = vmin.f32 %v171_v61, 16.0  ;;  %v298_v60 = vld [vmem:[#allocation2 + $0x150] sm:$0xff] }
  0xb1   :  { %311 = vmatpush.msrb.mxu0 %v300_v54 }
  0xb2   :  { %v133_v4 = vmul.f32 2.1237322e-06, %v825_v0  ;;  %v173_v5 = vmul.f32 2.1237322e-06, %v827_v1  ;;  %v144_v6 = vmul.f32 3.8918573e-05, %v825_v0 }
  0xb3   :  { %v184_v9 = vmul.f32 3.8918573e-05, %v827_v1  ;;  %312 = vmatpush.msrb.mxu0 %v299_v58 }
  0xb4   :  { %v134_v10 = vadd.f32 0.00028619796, %v133_v4  ;;  %v174_v11 = vadd.f32 0.00028619796, %v173_v5  ;;  %v145_v12 = vadd.f32 0.001143296, %v144_v6 }
  0xb5   :  { %v185_v15 = vadd.f32 0.001143296, %v184_v9  ;;  %313 = vmatpush.msrb.mxu0 %v298_v60 }
  0xb6   :  { %v135_v16 = vmul.f32 %v134_v10, %v825_v0  ;;  %v175_v17 = vmul.f32 %v174_v11, %v827_v1  ;;  %v146_v18 = vmul.f32 %v145_v12, %v825_v0 }
  0xb7   :  { %v186_v21 = vmul.f32 %v185_v15, %v827_v1  ;;  %314 = vmatpush.msrb.mxu0 %v297_v3 }
  0xb8   :  { %v136_v22 = vadd.f32 0.0036580483, %v135_v16  ;;  %v147_v23 = vadd.f32 0.014752088, %v146_v18  ;;  %v176_v27 = vadd.f32 0.0036580483, %v175_v17 }
  0xb9   :  { %v187_v26 = vadd.f32 0.014752088, %v186_v21  ;;  %315 = vmatpush.msrb.mxu0 %v296_v7 }
  0xba   :  { %v148_v28 = vmul.f32 %v147_v23, %v825_v0  ;;  %v137_v32 = vmul.f32 %v136_v22, %v825_v0  ;;  %v177_v35 = vmul.f32 %v176_v27, %v827_v1  ;;  %v293_v23 = vld [vmem:[#allocation2 + $0x128] sm:$0xff] }
  0xbb   :  { %v188_v31 = vmul.f32 %v187_v26, %v827_v1  ;;  %316 = vmatpush.msrb.mxu0 %v295_v14  ;;  %v372_v14 = vld [vmem:[#allocation2 + $0x198] sm:$0xff] }
  0xbc   :  { %v149_v33 = vadd.f32 0.112945676, %v148_v28  ;;  %v138_v38 = vadd.f32 0.05243302, %v137_v32  ;;  %v178_v43 = vadd.f32 0.05243302, %v177_v35 }
  0xbd   :  { %v189_v34 = vadd.f32 0.112945676, %v188_v31 }
  0xbe   :  { %v150_v36 = vmul.f32 %v149_v33, %v825_v0  ;;  %v139_v47 = vmul.f32 %v138_v38, %v825_v0  ;;  %v179_v51 = vmul.f32 %v178_v43, %v827_v1  ;;  %v290_v38 = vld [vmem:[#allocation2 + $0x110] sm:$0xff] }
  0xbf   :  { %v190_v37 = vmul.f32 %v189_v34, %v827_v1  ;;  %v128_v34 = vmul.f32 0.5, %v813_v53  ;;  %v385_v53 = vld [vmem:[#allocation2 + $0x200] sm:$0xff] }
  0xc0   :  { %v151_v39 = vadd.f32 0.4994258, %v150_v36  ;;  %v140_v55 = vadd.f32 0.18741608, %v139_v47  ;;  %v180_v59 = vadd.f32 0.18741608, %v179_v51 }
  0xc1   :  { %v191_v40 = vadd.f32 0.4994258, %v190_v37  ;;  %v291_v37 = vld [vmem:[#allocation2 + $0x118] sm:$0xff]  ;;  %v383_v47 = vld [vmem:[#allocation2 + $0x1f0] sm:$0xff]  ;;  %v381_v51 = vld [vmem:[#allocation2 + $0x1e0] sm:$0xff] }
  0xc2   :  { %v152_v44 = vmul.f32 %v151_v39, %v825_v0  ;;  %v141_v62 = vmul.f32 %v140_v55, %v825_v0  ;;  %v181_v4 = vmul.f32 %v180_v59, %v827_v1  ;;  %v289_v39 = vld [vmem:[#allocation2 + $0x108] sm:$0xff]  ;;  %v380_v55 = vld [vmem:[#allocation2 + $0x1d8] sm:$0xff]  ;;  %v379_v59 = vld [vmem:[#allocation2 + $0x1d0] sm:$0xff] }
  0xc3   :  { %v192_v45 = vmul.f32 %v191_v40, %v827_v1  ;;  %v294_v1 = vld [vmem:[#allocation2 + $0x130] sm:$0xff]  ;;  %v680_v40 = vld [vmem:[#allocation2 + $0x100] ss:$0 sm:$0xff] }
  0xc4   :  { %v153_v48 = vadd.f32 1.0, %v152_v44  ;;  %v142_v8 = vadd.f32 1.1283791, %v141_v62  ;;  %v182_v0 = vadd.f32 1.1283791, %v181_v4  ;;  %317 = vmatpush.msrb.mxu0 %v294_v1  ;;  %v424_v1 = vld [vmem:[#allocation2 + $0x290] sm:$0xff] }
  0xc5   :  { %v193_v49 = vadd.f32 1.0, %v192_v45  ;;  %v384_v45 = vld [vmem:[#allocation2 + $0x1f8] sm:$0xff]  ;;  %427 = vmatpush.msrb.mxu2 %v424_v1 }
  0xc6   :  { %687 = vrcp.f32 %v153_v48  ;;  %v165_v9 = vand.u32 2147483648, %v153_v48  ;;  %v163_v12 = vand.u32 2147483647, %v153_v48  ;;  %vm159_vm2 = vweird.f32 %v153_v48  ;;  %318 = vmatpush.msrb.mxu0 %v293_v23  ;;  %v421_v23 = vld [vmem:[#allocation2 + $0x278] sm:$0xff] }
  0xc7   :  { %689 = vrcp.f32 %v193_v49  ;;  %v205_v13 = vand.u32 2147483648, %v193_v49  ;;  %v203_v16 = vand.u32 2147483647, %v193_v49  ;;  %vm199_vm4 = vweird.f32 %v193_v49 }
  0xc8   :  { %v166_v18 = vor.u32 1.1754944e-38, %v165_v9  ;;  %v143_v20 = vmul.f32 %v142_v8, %v816_v56  ;;  %vm164_vm5 = vcmp.eq.f32.partialorder %v163_v12, 8.507059e+37  ;;  %v183_v24 = vmul.f32 %v182_v0, %v819_v57  ;;  %319 = vmatpush.msrb.mxu0 %v292_v29  ;;  %v375_v8 = vld [vmem:[#allocation2 + $0x1b0] sm:$0xff]  ;;  %v374_v9 = vld [vmem:[#allocation2 + $0x1a8] sm:$0xff]  ;;  %v373_v12 = vld [vmem:[#allocation2 + $0x1a0] sm:$0xff] }
  0xc9   :  { %v206_v22 = vor.u32 1.1754944e-38, %v205_v13  ;;  %vm204_vm7 = vcmp.eq.f32.partialorder %v203_v16, 8.507059e+37  ;;  %v127_v56 = vmul.f32 0.5, %v811_v52  ;;  %v386_v52 = vld [vmem:[#allocation2 + $0x208] sm:$0xff]  ;;  %v371_v16 = vld [vmem:[#allocation2 + $0x190] sm:$0xff]  ;;  %v418_v29 = vld [vmem:[#allocation2 + $0x260] sm:$0xff] }
  0xca   :  { %320 = vmatpush.msrb.mxu0 %v291_v37  ;;  %389 = vmatpush.msrb.mxu1 %v386_v52  ;;  %v412_v52 = vld [vmem:[#allocation2 + $0x230] sm:$0xff] }
  0xcc   :  { %v688_v61 = vpop.eup %687  ;;  %321 = vmatpush.msrb.mxu0 %v290_v38  ;;  %390 = vmatpush.msrb.mxu1 %v385_v53 }
  0xcd   :  { %v690_v63 = vpop.eup %689  ;;  %v155_v2 = vmul.f32 %v688_v61, %v153_v48  ;;  %vm160_vm0 = vweird.f32 %v688_v61 }
  0xce   :  { %v195_v5 = vmul.f32 %v690_v63, %v193_v49  ;;  %vm200_vm1 = vweird.f32 %v690_v63  ;;  %vm161_vm3 = vmor %vm159_vm2, %vm160_vm0  ;;  %322 = vmatpush.msrb.mxu0 %v289_v39  ;;  %391 = vmatpush.msrb.mxu1 %v384_v45  ;;  %v382_v49 = vld [vmem:[#allocation2 + $0x1e8] sm:$0xff]  ;;  %v414_v39 = vld [vmem:[#allocation2 + $0x240] sm:$0xff] }
  0xcf   :  { %v156_v6 = vsub.f32 1.0, %v155_v2  ;;  %vm201_vm6 = vmor %vm199_vm4, %vm200_vm1  ;;  %v377_v2 = vld [vmem:[#allocation2 + $0x1c0] sm:$0xff] }
  0xd0   :  { %v196_v10 = vsub.f32 1.0, %v195_v5  ;;  %392 = vmatpush.msrb.mxu1 %v383_v47  ;;  %v376_v5 = vld [vmem:[#allocation2 + $0x1b8] sm:$0xff] }
  0xd1   :  { %v157_v11 = vmul.f32 %v688_v61, %v156_v6 }
  0xd2   :  { %v197_v15 = vmul.f32 %v690_v63, %v196_v10  ;;  %393 = vmatpush.msrb.mxu1 %v382_v49 }
  0xd3   :  { %v158_v17 = vadd.f32 %v688_v61, %v157_v11 }
  0xd4   :  { %v198_v19 = vadd.f32 %v690_v63, %v197_v15  ;;  %394 = vmatpush.msrb.mxu1 %v381_v51 }
  0xd5   :  { %v162_v21 = vsel %vm161_vm3, %v688_v61, %v158_v17  ;;  %v378_v61 = vld [vmem:[#allocation2 + $0x1c8] sm:$0xff] }
  0xd6   :  { %v167_v25 = vsel %vm164_vm5, %v166_v18, %v162_v21  ;;  %v202_v26 = vsel %vm201_vm6, %v690_v63, %v198_v19  ;;  %395 = vmatpush.msrb.mxu1 %v380_v55  ;;  %v423_v18 = vld [vmem:[#allocation2 + $0x288] sm:$0xff]  ;;  %v422_v21 = vld [vmem:[#allocation2 + $0x280] sm:$0xff] }
  0xd7   :  { %v168_v27 = vmul.f32 %v167_v25, %v143_v20  ;;  %v207_v28 = vsel %vm204_vm7, %v206_v22, %v202_v26  ;;  %428 = vmatpush.msrb.mxu2 %v423_v18  ;;  %v420_v26 = vld [vmem:[#allocation2 + $0x270] sm:$0xff]  ;;  %v410_v55 = vld [vmem:[#allocation2 + $0x220] sm:$0xff] }
  0xd8   :  { %v208_v30 = vmul.f32 %v207_v28, %v183_v24  ;;  %396 = vmatpush.msrb.mxu1 %v379_v59 }
  0xd9   :  { %v668_v31 = vclamps-f32 %v168_v27, 1.0  ;;  %429 = vmatpush.msrb.mxu2 %v422_v21  ;;  %v419_v27 = vld [vmem:[#allocation2 + $0x268] sm:$0xff] }
  0xda   :  { %v669_v32 = vclamps-f32 %v208_v30, 1.0  ;;  %397 = vmatpush.msrb.mxu1 %v378_v61  ;;  %v417_v30 = vld [vmem:[#allocation2 + $0x258] sm:$0xff] }
  0xdb   :  { %v211_v33 = vadd.f32 1.0, %v668_v31  ;;  %430 = vmatpush.msrb.mxu2 %v421_v23  ;;  %v506_v61 = vld [vmem:[#allocation2 + $0x318] sm:$0xff]  ;;  %v493_v23 = vld [vmem:[#allocation2 + $0x2b0] sm:$0xff] }
  0xdc   :  { %v212_v35 = vadd.f32 1.0, %v669_v32  ;;  %398 = vmatpush.msrb.mxu1 %v377_v2  ;;  %509 = vmatpush.msrb.mxu3 %v506_v61  ;;  %v683_v2 = vld [vmem:[#allocation2 + $0x298] ss:$0 sm:$0xff]  ;;  %v532_v61 = vld [vmem:[#allocation2 + $0x340] sm:$0xff] }
  0xdd   :  { %v213_v36 = vmul.f32 %v211_v33, %v127_v56  ;;  %431 = vmatpush.msrb.mxu2 %v420_v26  ;;  %v416_v33 = vld [vmem:[#allocation2 + $0x250] sm:$0xff] }
  0xde   :  { %v214_v57 = vmul.f32 %v212_v35, %v128_v34  ;;  %399 = vmatpush.msrb.mxu1 %v376_v5  ;;  %v415_v35 = vld [vmem:[#allocation2 + $0x248] sm:$0xff] }
  0xdf   :  { %265 = vmatmul.f32.vlgmr.msra.gmra.mxu2 %v213_v36 }
  0xe0   :  { %285 = vmatmul.f32.vlgmr.msra.gmra.mxu3 %v214_v57  ;;  %400 = vmatpush.msrb.mxu1 %v375_v8  ;;  %v500_v8 = vld [vmem:[#allocation2 + $0x2e8] sm:$0xff] }
  0xe1   :  { %432 = vmatpush.msrb.mxu2 %v419_v27 }
  0xe2   :  { %401 = vmatpush.msrb.mxu1 %v374_v9 }
  0xe3   :  { %433 = vmatpush.msrb.mxu2 %v418_v29 }
  0xe4   :  { %402 = vmatpush.msrb.mxu1 %v373_v12  ;;  %v498_v12 = vld [vmem:[#allocation2 + $0x2d8] sm:$0xff] }
  0xe5   :  { %434 = vmatpush.msrb.mxu2 %v417_v30  ;;  %v544_v30 = vld [vmem:[#allocation2 + $0x3a0] sm:$0xff] }
  0xe6   :  { %403 = vmatpush.msrb.mxu1 %v372_v14  ;;  %547 = vmatpush.msra.mxu0 %v544_v30 }
  0xe7   :  { %435 = vmatpush.msrb.mxu2 %v416_v33  ;;  %v542_v33 = vld [vmem:[#allocation2 + $0x390] sm:$0xff] }
  0xe8   :  { %404 = vmatpush.msrb.mxu1 %v371_v16 }
  0xe9   :  { %436 = vmatpush.msrb.mxu2 %v415_v35  ;;  %v541_v35 = vld [vmem:[#allocation2 + $0x388] sm:$0xff] }
  0xeb   :  { %437 = vmatpush.msrb.mxu2 %v414_v39 }
 0x162   :  { %v266_v41 = vpop.f32.mrf.mxu2 }
 0x163   :  { %v267_v42 = vadd.f32 %v680_v40, %v266_v41  ;;  %v286_v43 = vpop.f32.mrf.mxu3  ;;  %v413_v41 = vld [vmem:[#allocation2 + $0x238] sm:$0xff] }
 0x164   :  { %438 = vmatpush.msrb.mxu2 %v413_v41  ;;  %v537_v41 = vld [vmem:[#allocation2 + $0x368] sm:$0xff] }
 0x165   :  { %v287_v44 = vadd.f32 %v286_v43, %v267_v42 }
 0x166   :  { %439 = vmatpush.msrb.mxu2 %v412_v52  ;;  %v536_v52 = vld [vmem:[#allocation2 + $0x360] sm:$0xff] }
 0x167   :  { %323 = vmatmul.f32.vlgmr.msrb.gmra.mxu0 %v287_v44 }
 0x1e4   :  { %v324_v48 = vpop.f32.mrf.mxu0 }
 0x1e5   :  { %v853_v50 = vadd.f32 %v681_v46, %v324_v48  ;;  %v411_v46 = vld [vmem:[#allocation2 + $0x228] sm:$0xff] }
 0x1e6   :  { %440 = vmatpush.msrb.mxu2 %v411_v46 }
 0x1e7   :  { %v856_v54 = vmul.f32 0.70710677, %v853_v50  ;;  %v327_v48 = vmul.f32 0.5, %v853_v50 }
 0x1e8   :  { %441 = vmatpush.msrb.mxu2 %v410_v55 }
 0x1e9   :  { %v329_v58 = vmul.f32 %v856_v54, %v856_v54 }
 0x1eb   :  { %v330_v60 = vmin.f32 %v329_v58, 16.0  ;;  %v409_v58 = vld [vmem:[#allocation2 + $0x218] sm:$0xff] }
 0x1ec   :  { %442 = vmatpush.msrb.mxu2 %v409_v58  ;;  %v533_v58 = vld [vmem:[#allocation2 + $0x348] sm:$0xff] }
 0x1ed   :  { %v331_v62 = vmul.f32 2.1237322e-06, %v330_v60  ;;  %v342_v63 = vmul.f32 3.8918573e-05, %v330_v60 }
 0x1ef   :  { %v332_v3 = vadd.f32 0.00028619796, %v331_v62  ;;  %v343_v4 = vadd.f32 0.001143296, %v342_v63  ;;  %v505_v62 = vld [vmem:[#allocation2 + $0x310] sm:$0xff]  ;;  %v504_v63 = vld [vmem:[#allocation2 + $0x308] sm:$0xff] }
 0x1f0   :  { %510 = vmatpush.msrb.mxu3 %v505_v62 }
 0x1f1   :  { %v333_v6 = vmul.f32 %v332_v3, %v330_v60  ;;  %v344_v7 = vmul.f32 %v343_v4, %v330_v60  ;;  %v503_v3 = vld [vmem:[#allocation2 + $0x300] sm:$0xff]  ;;  %v502_v4 = vld [vmem:[#allocation2 + $0x2f8] sm:$0xff] }
 0x1f2   :  { %511 = vmatpush.msrb.mxu3 %v504_v63 }
 0x1f3   :  { %v345_v10 = vadd.f32 0.014752088, %v344_v7  ;;  %v334_v11 = vadd.f32 0.0036580483, %v333_v6  ;;  %v501_v6 = vld [vmem:[#allocation2 + $0x2f0] sm:$0xff] }
 0x1f4   :  { %512 = vmatpush.msrb.mxu3 %v503_v3 }
 0x1f5   :  { %v346_v13 = vmul.f32 %v345_v10, %v330_v60  ;;  %v335_v15 = vmul.f32 %v334_v11, %v330_v60  ;;  %v499_v10 = vld [vmem:[#allocation2 + $0x2e0] sm:$0xff] }
 0x1f6   :  { %513 = vmatpush.msrb.mxu3 %v502_v4 }
 0x1f7   :  { %v347_v0 = vadd.f32 0.112945676, %v346_v13  ;;  %v336_v20 = vadd.f32 0.05243302, %v335_v15 }
 0x1f8   :  { %514 = vmatpush.msrb.mxu3 %v501_v6 }
 0x1f9   :  { %v348_v17 = vmul.f32 %v347_v0, %v330_v60  ;;  %v337_v25 = vmul.f32 %v336_v20, %v330_v60  ;;  %v497_v0 = vld [vmem:[#allocation2 + $0x2d0] sm:$0xff]  ;;  %v494_v20 = vld [vmem:[#allocation2 + $0x2b8] sm:$0xff] }
 0x1fa   :  { %515 = vmatpush.msrb.mxu3 %v500_v8  ;;  %v530_v8 = vld [vmem:[#allocation2 + $0x330] sm:$0xff] }
 0x1fb   :  { %v349_v19 = vadd.f32 0.4994258, %v348_v17  ;;  %v338_v28 = vadd.f32 0.18741608, %v337_v25  ;;  %v496_v17 = vld [vmem:[#allocation2 + $0x2c8] sm:$0xff] }
 0x1fc   :  { %516 = vmatpush.msrb.mxu3 %v499_v10  ;;  %v492_v25 = vld [vmem:[#allocation2 + $0x2a8] sm:$0xff] }
 0x1fd   :  { %v350_v22 = vmul.f32 %v349_v19, %v330_v60  ;;  %v339_v32 = vmul.f32 %v338_v28, %v330_v60  ;;  %v495_v19 = vld [vmem:[#allocation2 + $0x2c0] sm:$0xff] }
 0x1fe   :  { %517 = vmatpush.msrb.mxu3 %v498_v12  ;;  %v491_v28 = vld [vmem:[#allocation2 + $0x2a0] sm:$0xff]  ;;  %v626_v12 = vld [vmem:[#allocation2 + $0x428] sm:$0xff] }
 0x1ff   :  { %v351_v24 = vadd.f32 1.0, %v350_v22  ;;  %v340_v57 = vadd.f32 1.1283791, %v339_v32  ;;  %629 = vmatpush.msra.mxu1 %v626_v12 }
 0x200   :  { %518 = vmatpush.msrb.mxu3 %v497_v0  ;;  %v685_v0 = vld [vmem:[#allocation2 + $0x3a8] ss:$0 sm:$0xff] }
 0x201   :  { %691 = vrcp.f32 %v351_v24  ;;  %v363_v36 = vand.u32 2147483648, %v351_v24  ;;  %v361_v38 = vand.u32 2147483647, %v351_v24  ;;  %vm357_vm9 = vweird.f32 %v351_v24 }
 0x202   :  { %v341_v43 = vmul.f32 %v340_v57, %v856_v54  ;;  %v682_v54 = vld [vmem:[#allocation2 + $0x210] ss:$0 sm:$0xff]  ;;  %519 = vmatpush.msrb.mxu3 %v496_v17 }
 0x203   :  { %v364_v42 = vor.u32 1.1754944e-38, %v363_v36  ;;  %vm362_vm11 = vcmp.eq.f32.partialorder %v361_v38, 8.507059e+37  ;;  %v539_v38 = vld [vmem:[#allocation2 + $0x378] sm:$0xff] }
 0x204   :  { %520 = vmatpush.msrb.mxu3 %v495_v19  ;;  %v620_v19 = vld [vmem:[#allocation2 + $0x3f8] sm:$0xff] }
 0x206   :  { %521 = vmatpush.msrb.mxu3 %v494_v20 }
 0x207   :  { %v692_v31 = vpop.eup %691 }
 0x208   :  { %v353_v56 = vmul.f32 %v692_v31, %v351_v24  ;;  %vm358_vm8 = vweird.f32 %v692_v31  ;;  %522 = vmatpush.msrb.mxu3 %v493_v23  ;;  %v618_v23 = vld [vmem:[#allocation2 + $0x3e8] sm:$0xff] }
 0x209   :  { %vm359_vm10 = vmor %vm357_vm9, %vm358_vm8 }
 0x20a   :  { %v354_v34 = vsub.f32 1.0, %v353_v56  ;;  %523 = vmatpush.msrb.mxu3 %v492_v25 }
 0x20c   :  { %v355_v37 = vmul.f32 %v692_v31, %v354_v34  ;;  %524 = vmatpush.msrb.mxu3 %v491_v28 }
 0x20e   :  { %v356_v40 = vadd.f32 %v692_v31, %v355_v37  ;;  %v540_v37 = vld [vmem:[#allocation2 + $0x380] sm:$0xff] }
 0x210   :  { %v360_v44 = vsel %vm359_vm10, %v692_v31, %v356_v40  ;;  %v543_v31 = vld [vmem:[#allocation2 + $0x398] sm:$0xff]  ;;  %v538_v40 = vld [vmem:[#allocation2 + $0x370] sm:$0xff] }
 0x211   :  { %v365_v53 = vsel %vm362_vm11, %v364_v42, %v360_v44  ;;  %548 = vmatpush.msra.mxu0 %v543_v31 }
 0x212   :  { %v366_v45 = vmul.f32 %v365_v53, %v341_v43 }
 0x213   :  { %549 = vmatpush.msra.mxu0 %v542_v33 }
 0x214   :  { %v670_v47 = vclamps-f32 %v366_v45, 1.0  ;;  %v535_v45 = vld [vmem:[#allocation2 + $0x358] sm:$0xff] }
 0x215   :  { %550 = vmatpush.msra.mxu0 %v541_v35 }
 0x216   :  { %v369_v49 = vadd.f32 1.0, %v670_v47 }
 0x217   :  { %551 = vmatpush.msra.mxu0 %v540_v37 }
 0x218   :  { %v370_v51 = vmul.f32 %v369_v49, %v327_v48 }
 0x219   :  { %552 = vmatpush.msra.mxu0 %v539_v38  ;;  %v612_v38 = vld [vmem:[#allocation2 + $0x3b8] sm:$0xff] }
 0x21a   :  { %405 = vmatmul.f32.vlgmr.msrb.gmra.mxu1 %v370_v51  ;;  %v534_v51 = vld [vmem:[#allocation2 + $0x350] sm:$0xff] }
 0x21b   :  { %553 = vmatpush.msra.mxu0 %v538_v40 }
 0x21d   :  { %554 = vmatpush.msra.mxu0 %v537_v41 }
 0x21f   :  { %555 = vmatpush.msra.mxu0 %v536_v52 }
 0x221   :  { %556 = vmatpush.msra.mxu0 %v535_v45 }
 0x223   :  { %557 = vmatpush.msra.mxu0 %v534_v51 }
 0x225   :  { %558 = vmatpush.msra.mxu0 %v533_v58 }
 0x227   :  { %559 = vmatpush.msra.mxu0 %v532_v61 }
 0x297   :  { %v406_v59 = vpop.f32.mrf.mxu1 }
 0x298   :  { %v407_v60 = vadd.f32 %v682_v54, %v406_v59 }
 0x29a   :  { %443 = vmatmul.f32.vlgmr.msrb.gmra.mxu2 %v407_v60 }
 0x31d   :  { %v444_v50 = vpop.f32.mrf.mxu2 }
 0x31e   :  { %v862_v5 = vadd.f32 %v683_v2, %v444_v50  ;;  %v531_v2 = vld [vmem:[#allocation2 + $0x338] sm:$0xff] }
 0x31f   :  { %560 = vmatpush.msra.mxu0 %v531_v2 }
 0x320   :  { %v865_v7 = vmul.f32 0.70710677, %v862_v5  ;;  %v447_v50 = vmul.f32 0.5, %v862_v5 }
 0x321   :  { %561 = vmatpush.msra.mxu0 %v530_v8 }
 0x322   :  { %v449_v9 = vmul.f32 %v865_v7, %v865_v7 }
 0x324   :  { %v450_v11 = vmin.f32 %v449_v9, 16.0  ;;  %v529_v9 = vld [vmem:[#allocation2 + $0x328] sm:$0xff] }
 0x325   :  { %562 = vmatpush.msra.mxu0 %v529_v9 }
 0x326   :  { %v451_v13 = vmul.f32 2.1237322e-06, %v450_v11  ;;  %v462_v14 = vmul.f32 3.8918573e-05, %v450_v11 }
 0x328   :  { %v452_v15 = vadd.f32 0.00028619796, %v451_v13  ;;  %v463_v16 = vadd.f32 0.001143296, %v462_v14  ;;  %v625_v13 = vld [vmem:[#allocation2 + $0x420] sm:$0xff]  ;;  %v624_v14 = vld [vmem:[#allocation2 + $0x418] sm:$0xff] }
 0x329   :  { %630 = vmatpush.msra.mxu1 %v625_v13 }
 0x32a   :  { %v453_v1 = vmul.f32 %v452_v15, %v450_v11  ;;  %v464_v18 = vmul.f32 %v463_v16, %v450_v11  ;;  %v623_v15 = vld [vmem:[#allocation2 + $0x410] sm:$0xff]  ;;  %v622_v16 = vld [vmem:[#allocation2 + $0x408] sm:$0xff] }
 0x32b   :  { %631 = vmatpush.msra.mxu1 %v624_v14 }
 0x32c   :  { %v465_v21 = vadd.f32 0.014752088, %v464_v18  ;;  %v454_v22 = vadd.f32 0.0036580483, %v453_v1  ;;  %v621_v1 = vld [vmem:[#allocation2 + $0x400] sm:$0xff] }
 0x32d   :  { %632 = vmatpush.msra.mxu1 %v623_v15 }
 0x32e   :  { %v466_v24 = vmul.f32 %v465_v21, %v450_v11  ;;  %v455_v27 = vmul.f32 %v454_v22, %v450_v11  ;;  %v619_v21 = vld [vmem:[#allocation2 + $0x3f0] sm:$0xff] }
 0x32f   :  { %633 = vmatpush.msra.mxu1 %v622_v16 }
 0x330   :  { %v467_v26 = vadd.f32 0.112945676, %v466_v24  ;;  %v456_v56 = vadd.f32 0.05243302, %v455_v27 }
 0x331   :  { %634 = vmatpush.msra.mxu1 %v621_v1 }
 0x332   :  { %v468_v29 = vmul.f32 %v467_v26, %v450_v11  ;;  %v457_v57 = vmul.f32 %v456_v56, %v450_v11  ;;  %v617_v26 = vld [vmem:[#allocation2 + $0x3e0] sm:$0xff] }
 0x333   :  { %635 = vmatpush.msra.mxu1 %v620_v19 }
 0x334   :  { %v469_v32 = vadd.f32 0.4994258, %v468_v29  ;;  %v458_v39 = vadd.f32 0.18741608, %v457_v57  ;;  %v616_v29 = vld [vmem:[#allocation2 + $0x3d8] sm:$0xff] }
 0x335   :  { %636 = vmatpush.msra.mxu1 %v619_v21 }
 0x336   :  { %v470_v34 = vmul.f32 %v469_v32, %v450_v11  ;;  %v459_v43 = vmul.f32 %v458_v39, %v450_v11  ;;  %v615_v32 = vld [vmem:[#allocation2 + $0x3d0] sm:$0xff] }
 0x337   :  { %637 = vmatpush.msra.mxu1 %v618_v23  ;;  %v611_v39 = vld [vmem:[#allocation2 + $0x3b0] sm:$0xff] }
 0x338   :  { %v471_v36 = vadd.f32 1.0, %v470_v34  ;;  %v460_v47 = vadd.f32 1.1283791, %v459_v43  ;;  %v614_v34 = vld [vmem:[#allocation2 + $0x3c8] sm:$0xff] }
 0x339   :  { %638 = vmatpush.msra.mxu1 %v617_v26 }
 0x33a   :  { %693 = vrcp.f32 %v471_v36  ;;  %v483_v46 = vand.u32 2147483648, %v471_v36  ;;  %v481_v49 = vand.u32 2147483647, %v471_v36  ;;  %vm477_vm13 = vweird.f32 %v471_v36 }
 0x33b   :  { %v461_v59 = vmul.f32 %v460_v47, %v865_v7  ;;  %v684_v7 = vld [vmem:[#allocation2 + $0x320] ss:$0 sm:$0xff]  ;;  %639 = vmatpush.msra.mxu1 %v616_v29 }
 0x33c   :  { %v484_v54 = vor.u32 1.1754944e-38, %v483_v46  ;;  %vm482_vm15 = vcmp.eq.f32.partialorder %v481_v49, 8.507059e+37 }
 0x33d   :  { %640 = vmatpush.msra.mxu1 %v615_v32 }
 0x33f   :  { %641 = vmatpush.msra.mxu1 %v614_v34 }
 0x340   :  { %v694_v42 = vpop.eup %693 }
 0x341   :  { %v473_v44 = vmul.f32 %v694_v42, %v471_v36  ;;  %vm478_vm12 = vweird.f32 %v694_v42  ;;  %v613_v36 = vld [vmem:[#allocation2 + $0x3c0] sm:$0xff] }
 0x342   :  { %vm479_vm14 = vmor %vm477_vm13, %vm478_vm12  ;;  %642 = vmatpush.msra.mxu1 %v613_v36 }
 0x343   :  { %v474_v53 = vsub.f32 1.0, %v473_v44 }
 0x344   :  { %643 = vmatpush.msra.mxu1 %v612_v38 }
 0x345   :  { %v475_v48 = vmul.f32 %v694_v42, %v474_v53 }
 0x346   :  { %644 = vmatpush.msra.mxu1 %v611_v39 }
 0x347   :  { %v476_v55 = vadd.f32 %v694_v42, %v475_v48 }
 0x349   :  { %v480_v60 = vsel %vm479_vm14, %v694_v42, %v476_v55 }
 0x34a   :  { %v485_v62 = vsel %vm482_vm15, %v484_v54, %v480_v60 }
 0x34b   :  { %v486_v63 = vmul.f32 %v485_v62, %v461_v59 }
 0x34d   :  { %v671_v3 = vclamps-f32 %v486_v63, 1.0 }
 0x34f   :  { %v489_v4 = vadd.f32 1.0, %v671_v3 }
 0x351   :  { %v490_v6 = vmul.f32 %v489_v4, %v447_v50 }
 0x353   :  { %525 = vmatmul.f32.vlgmr.msrb.gmra.mxu3 %v490_v6  ;;  %v686_v6 = vld [vmem:[#allocation2 + $0x430] ss:$0 sm:$0xff] }
 0x3d6   :  { %v526_v10 = vpop.f32.mrf.mxu3 }
 0x3d7   :  { %v527_v11 = vadd.f32 %v684_v7, %v526_v10 }
 0x3d9   :  { %563 = vmatmul.f32.vlgmr.msra.gmra.mxu0 %v527_v11 }
 0x456   :  { %v564_v5 = vpop.f32.mrf.mxu0 }
 0x457   :  { %v871_v17 = vadd.f32 %v685_v0, %v564_v5 }
 0x459   :  { %v568_v18 = vmul.f32 0.70710677, %v871_v17  ;;  %v567_v3 = vmul.f32 0.5, %v871_v17 }
 0x45b   :  { %v569_v20 = vmul.f32 %v568_v18, %v568_v18 }
 0x45d   :  { %v570_v22 = vmin.f32 %v569_v20, 16.0 }
 0x45f   :  { %v571_v24 = vmul.f32 2.1237322e-06, %v570_v22  ;;  %v582_v25 = vmul.f32 3.8918573e-05, %v570_v22 }
 0x461   :  { %v572_v27 = vadd.f32 0.00028619796, %v571_v24  ;;  %v583_v28 = vadd.f32 0.001143296, %v582_v25 }
 0x463   :  { %v573_v30 = vmul.f32 %v572_v27, %v570_v22  ;;  %v584_v31 = vmul.f32 %v583_v28, %v570_v22 }
 0x465   :  { %v585_v56 = vadd.f32 0.014752088, %v584_v31  ;;  %v574_v33 = vadd.f32 0.0036580483, %v573_v30 }
 0x467   :  { %v586_v35 = vmul.f32 %v585_v56, %v570_v22  ;;  %v575_v37 = vmul.f32 %v574_v33, %v570_v22 }
 0x469   :  { %v587_v57 = vadd.f32 0.112945676, %v586_v35  ;;  %v576_v42 = vadd.f32 0.05243302, %v575_v37 }
 0x46b   :  { %v588_v40 = vmul.f32 %v587_v57, %v570_v22  ;;  %v577_v52 = vmul.f32 %v576_v42, %v570_v22 }
 0x46d   :  { %v589_v41 = vadd.f32 0.4994258, %v588_v40  ;;  %v578_v53 = vadd.f32 0.18741608, %v577_v52 }
 0x46f   :  { %v590_v43 = vmul.f32 %v589_v41, %v570_v22  ;;  %v579_v46 = vmul.f32 %v578_v53, %v570_v22 }
 0x471   :  { %v591_v44 = vadd.f32 1.0, %v590_v43  ;;  %v580_v51 = vadd.f32 1.1283791, %v579_v46 }
 0x473   :  { %695 = vrcp.f32 %v591_v44  ;;  %v603_v49 = vand.u32 2147483648, %v591_v44  ;;  %v601_v58 = vand.u32 2147483647, %v591_v44  ;;  %vm597_vm1 = vweird.f32 %v591_v44 }
 0x474   :  { %v581_v60 = vmul.f32 %v580_v51, %v568_v18 }
 0x475   :  { %v604_v59 = vor.u32 1.1754944e-38, %v603_v49  ;;  %vm602_vm3 = vcmp.eq.f32.partialorder %v601_v58, 8.507059e+37 }
 0x479   :  { %v696_v45 = vpop.eup %695 }
 0x47a   :  { %v593_v47 = vmul.f32 %v696_v45, %v591_v44  ;;  %vm598_vm0 = vweird.f32 %v696_v45 }
 0x47b   :  { %vm599_vm2 = vmor %vm597_vm1, %vm598_vm0 }
 0x47c   :  { %v594_v48 = vsub.f32 1.0, %v593_v47 }
 0x47e   :  { %v595_v55 = vmul.f32 %v696_v45, %v594_v48 }
 0x480   :  { %v596_v54 = vadd.f32 %v696_v45, %v595_v55 }
 0x482   :  { %v600_v61 = vsel %vm599_vm2, %v696_v45, %v596_v54 }
 0x483   :  { %v605_v62 = vsel %vm602_vm3, %v604_v59, %v600_v61 }
 0x484   :  { %v606_v63 = vmul.f32 %v605_v62, %v581_v60 }
 0x486   :  { %v672_v2 = vclamps-f32 %v606_v63, 1.0 }
 0x488   :  { %v609_v50 = vadd.f32 1.0, %v672_v2 }
 0x48a   :  { %v610_v4 = vmul.f32 %v609_v50, %v567_v3 }
 0x48c   :  { %645 = vmatmul.f32.vlgmr.msra.gmra.mxu1 %v610_v4 }
 0x509   :  { %v646_v8 = vpop.f32.mrf.mxu1 }
 0x50a   :  { %v647_v9 = vadd.f32 %v686_v6, %v646_v8 }
 0x50c   :  { %649 = vst [vmem:[#allocation7] sm:$0xff] %v647_v9 }
 0x50d   :  { %660 = dma.vmem_to_hbm [thread:$0]  %s656_s26, 128, %s658_s29, [#allocation4]  }
 0x50e   :  { %773 = dma.done.wait [#allocation4], 128  }
 0x50f   :  { %774 = vsyncadd [#allocation4], 4294967168 }
 0x510   :  { %665 = vsyncpa [#allocation3], 1 }
 0x511   :  { %666 = vsyncpa [#allocation6], 1 }
 0x512   :  { %667 = vsyncpa [#allocation4], 1 }

</bundles_post_ra>
